<compile_context>
chip_gen: v5e
topology: v5e:2x2
jax: 0.10.0
libtpu: 0.0.40
codegen_flags: <defaults>
</compile_context>

<pallas_src>
import jax
import jax.numpy as jnp
from jax.experimental import pallas as pl
from jax.experimental.pallas import tpu as pltpu

_LANE = 128
_SUBLANE = 8
_DEF_BLOCK_CAMS = 128 * _LANE   # 16384 cameras per block (~2.1 MB / grid step)
_MIN_SPLIT_CAMS = 64 * _LANE    # >= 8192 cameras -> keep >= 2 parallel steps (v7x)


def _ceil_div(a, b):
    return (a + b - 1) // b


def _stack_transform_kernel(k_ref, t_ref, o_ref):
    # k_ref: (3, 3, C, 128)  ->  K[i, k, chunk, cam]
    # t_ref: (3, 4, C, 128)  ->  T[k, j, chunk, cam]   (top 3 rows of T_cw)
    # o_ref: (3, 4, C, 128)  ->  out[i, j, chunk, cam] = sum_k K[i,k]*T[k,j]
    k = k_ref[...]
    t = t_ref[...]
    # Unrolled contraction over k = 0..2: broadcasts only on the leading dims,
    # every multiply/add/store is a full (8,128)-tiled VPU op.
    o_ref[...] = (k[:, 0:1] * t[0:1]
                  + k[:, 1:2] * t[1:2]
                  + k[:, 2:3] * t[2:3])


def _choose_blocks(n, block_cams):
    """Return (grid_steps, chunks_per_block, padded_camera_count)."""
    s = _ceil_div(n, _LANE)                       # number of 128-camera chunks
    max_chunks = max(block_cams // _LANE, _SUBLANE)
    g = _ceil_div(s, max_chunks)
    if g == 1 and s * _LANE >= _MIN_SPLIT_CAMS:
        g = 2                                     # v7x: let megacore split the grid
    if g == 1:
        c = s                                     # full-extent block: any size allowed
    else:
        c = _ceil_div(_ceil_div(s, g), _SUBLANE) * _SUBLANE   # sublane-divisible block
    return g, c, c * g * _LANE


def _matmul_lane(Kl, Tl, block_cams=_DEF_BLOCK_CAMS):
    """Camera-last matmul: Kl (3,3,N), Tl (3,4,N)  ->  (3,4,N) float32."""
    Kl = Kl.astype(jnp.float32)
    Tl = Tl.astype(jnp.float32)
    n = Kl.shape[-1]

    g, c, n_pad = _choose_blocks(n, block_cams)
    if n_pad != n:
        pad = n_pad - n
        Kl = jnp.pad(Kl, ((0, 0), (0, 0), (0, pad)))
        Tl = jnp.pad(Tl, ((0, 0), (0, 0), (0, pad)))

    s_pad = n_pad // _LANE
    # Free row-major reshapes: fold cameras onto (sublane, lane).
    K4 = Kl.reshape(3, 3, s_pad, _LANE)
    T4 = Tl.reshape(3, 4, s_pad, _LANE)

    out4 = pl.pallas_call(
        _stack_transform_kernel,
        out_shape=jax.ShapeDtypeStruct((3, 4, s_pad, _LANE), jnp.float32),
        grid_spec=pltpu.PrefetchScalarGridSpec(
            num_scalar_prefetch=0,
            grid=(g,),
            in_specs=[
                pl.BlockSpec((3, 3, c, _LANE), lambda i: (0, 0, i, 0)),
                pl.BlockSpec((3, 4, c, _LANE), lambda i: (0, 0, i, 0)),
            ],
            out_specs=pl.BlockSpec((3, 4, c, _LANE), lambda i: (0, 0, i, 0)),
        ),
        compiler_params=pltpu.CompilerParams(
            dimension_semantics=("parallel",)),
        cost_estimate=pl.CostEstimate(
            flops=60 * n_pad, transcendentals=0, bytes_accessed=132 * n_pad),
    )(K4, T4)

    # Camera-last result (3, 4, N); caller decides whether to transpose.
    return out4.reshape(3, 4, n_pad)[:, :, :n]


def stack_transformations_pallas(K, T_cw, *, block_cams=_DEF_BLOCK_CAMS):
    """Camera-first arrays: K (N,3,3), T_cw (N,4,4) -> transformation (N,3,4)."""
    Kl = jnp.transpose(K.astype(jnp.float32), (1, 2, 0))              # (3, 3, N)
    Tl = jnp.transpose(T_cw[:, :3, :].astype(jnp.float32), (1, 2, 0))  # (3, 4, N)
    out_lane = _matmul_lane(Kl, Tl, block_cams)
    return jnp.transpose(out_lane, (2, 0, 1))


def stack_transformations(camera_params: dict, *, small_n_threshold: int = 1024,
                          block_cams: int = _DEF_BLOCK_CAMS):
    """Matches the PyTorch forward: dict of per-camera params -> (transformation, T_cw).

    For small N (the realistic dict case) a fused einsum wins over any kernel
    launch; for large N the Pallas path builds the camera-last layout directly
    (no wrapper transposes on the kernel inputs).
    """
    vals = list(camera_params.values())
    n = len(vals)
    T_cw = jnp.stack([jnp.asarray(cp["T_cw"], dtype=jnp.float32) for cp in vals])  # (N,4,4)

    if n <= small_n_threshold:
        K = jnp.stack([jnp.asarray(cp["K"], dtype=jnp.float32) for cp in vals])    # (N,3,3)
        transformation = jnp.einsum("nij,njk->nik", K, T_cw[:, :3, :])
    else:
        # Camera-last layout built directly -> no transposes in front of the kernel.
        Kl = jnp.stack([jnp.asarray(cp["K"], dtype=jnp.float32)
                        for cp in vals], axis=-1)                                   # (3,3,N)
        Tl = jnp.stack([jnp.asarray(cp["T_cw"], dtype=jnp.float32)[:3, :]
                        for cp in vals], axis=-1)                                   # (3,4,N)
        # Output transpose kept only because the module's contract is (N,3,4);
        # downstream consumers can call _matmul_lane directly for the
        # lane-dense (3,4,N) layout and skip it.
        transformation = jnp.transpose(_matmul_lane(Kl, Tl, block_cams), (2, 0, 1))
    return transformation, T_cw


if __name__ == "__main__":
    key = jax.random.PRNGKey(0)

    # --- Test 1: dict-of-cameras path (module interface), small N ---
    num_cams = 4
    camera_params = {}
    for cidx in range(num_cams):
        key, k1, k2 = jax.random.split(key, 3)
        K = jax.random.normal(k1, (3, 3), dtype=jnp.float32) * 10.0
        top = jax.random.normal(k2, (3, 4), dtype=jnp.float32)
        bottom = jnp.array([[0.0, 0.0, 0.0, 1.0]], dtype=jnp.float32)
        camera_params[f"cam{cidx}"] = {"K": K,
                                       "T_cw": jnp.concatenate([top, bottom], axis=0)}

    K_ref = jnp.stack([cp["K"] for cp in camera_params.values()])
    T_ref = jnp.stack([cp["T_cw"] for cp in camera_params.values()])
    trans_ref = jnp.einsum("nij,njk->nik", K_ref, T_ref[:, :3, :])

    # 1a: default (einsum fast path for tiny N)
    transformation, T_cw_out = stack_transformations(camera_params)
    transformation = jax.block_until_ready(transformation)
    T_cw_out = jax.block_until_ready(T_cw_out)
    assert transformation.shape == (num_cams, 3, 4) and transformation.dtype == jnp.float32
    assert T_cw_out.shape == (num_cams, 4, 4) and T_cw_out.dtype == jnp.float32
    assert jnp.allclose(transformation, trans_ref, atol=1e-4, rtol=1e-4)
    assert jnp.allclose(T_cw_out, T_ref)

    # 1b: force the Pallas kernel path on the same dict
    transformation_k, T_cw_k = stack_transformations(camera_params, small_n_threshold=0)
    transformation_k = jax.block_until_ready(transformation_k)
    assert transformation_k.shape == (num_cams, 3, 4)
    assert jnp.allclose(transformation_k, trans_ref, atol=1e-4, rtol=1e-4)
    assert jnp.allclose(T_cw_k, T_ref)

    # --- Test 2: array path, non-multiple-of-128 camera count (single block) ---
    key, k1, k2 = jax.random.split(key, 3)
    N2 = 260                              # pads to 384 cameras, 3 chunks, grid=(1,)
    K2 = jax.random.normal(k1, (N2, 3, 3), dtype=jnp.float32)
    T2 = jax.random.normal(k2, (N2, 4, 4), dtype=jnp.float32)
    trans2 = jax.block_until_ready(stack_transformations_pallas(K2, T2))
    trans2_ref = jnp.einsum("nij,njk->nik", K2, T2[:, :3, :])
    assert trans2.shape == (N2, 3, 4)
    assert jnp.allclose(trans2, trans2_ref, atol=1e-4, rtol=1e-4)

    # --- Test 3: multi-block grid with sublane-packed blocks (small block size) ---
    key, k1, k2 = jax.random.split(key, 3)
    N3 = 2100                             # with block_cams=1024: grid=(3,), C=8
    K3 = jax.random.normal(k1, (N3, 3, 3), dtype=jnp.float32)
    T3 = jax.random.normal(k2, (N3, 4, 4), dtype=jnp.float32)
    trans3 = jax.block_until_ready(
        stack_transformations_pallas(K3, T3, block_cams=1024))
    trans3_ref = jnp.einsum("nij,njk->nik", K3, T3[:, :3, :])
    assert trans3.shape == (N3, 3, 4)
    assert jnp.allclose(trans3, trans3_ref, atol=1e-4, rtol=1e-4)

    print("KERNEL_OK")
</pallas_src>

<mosaic_0001>
module attributes {stable_mosaic.version = 11 : i64} {
  func.func @_stack_transform_kernel(%arg0: i32, %arg1: memref<3x3x1x128xf32, #tpu.memory_space<vmem>>, %arg2: memref<3x4x1x128xf32, #tpu.memory_space<vmem>>, %arg3: memref<3x4x1x128xf32, #tpu.memory_space<vmem>>) attributes {dimension_semantics = [#tpu.dimension_semantics<parallel>], iteration_bounds = array<i64: 1>, scalar_prefetch = 0 : i64, scratch_operands = 0 : i64, tpu.core_type = #tpu.core_type<tc>, window_params = [{transform_indices = @transform_0, window_bounds = array<i64: 3, 3, 1, 128>}, {transform_indices = @transform_1, window_bounds = array<i64: 3, 4, 1, 128>}, {transform_indices = @transform_2, window_bounds = array<i64: 3, 4, 1, 128>}]} {
    %c0 = arith.constant 0 : index
    %c0_0 = arith.constant 0 : index
    %c0_1 = arith.constant 0 : index
    %c0_2 = arith.constant 0 : index
    %0 = vector.load %arg1[%c0, %c0_0, %c0_1, %c0_2] : memref<3x3x1x128xf32, #tpu.memory_space<vmem>>, vector<3x3x1x128xf32>
    %c0_3 = arith.constant 0 : index
    %c0_4 = arith.constant 0 : index
    %c0_5 = arith.constant 0 : index
    %c0_6 = arith.constant 0 : index
    %1 = vector.load %arg2[%c0_3, %c0_4, %c0_5, %c0_6] : memref<3x4x1x128xf32, #tpu.memory_space<vmem>>, vector<3x4x1x128xf32>
    %2 = vector.extract_strided_slice %0 {offsets = [0, 0, 0, 0], sizes = [3, 1, 1, 128], strides = [1, 1, 1, 1]} : vector<3x3x1x128xf32> to vector<3x1x1x128xf32>
    %3 = vector.extract_strided_slice %1 {offsets = [0, 0, 0, 0], sizes = [1, 4, 1, 128], strides = [1, 1, 1, 1]} : vector<3x4x1x128xf32> to vector<1x4x1x128xf32>
    %4 = vector.broadcast %2 : vector<3x1x1x128xf32> to vector<3x4x1x128xf32>
    %5 = vector.broadcast %3 : vector<1x4x1x128xf32> to vector<3x4x1x128xf32>
    %6 = arith.mulf %4, %5 : vector<3x4x1x128xf32>
    %7 = vector.extract_strided_slice %0 {offsets = [0, 1, 0, 0], sizes = [3, 1, 1, 128], strides = [1, 1, 1, 1]} : vector<3x3x1x128xf32> to vector<3x1x1x128xf32>
    %8 = vector.extract_strided_slice %1 {offsets = [1, 0, 0, 0], sizes = [1, 4, 1, 128], strides = [1, 1, 1, 1]} : vector<3x4x1x128xf32> to vector<1x4x1x128xf32>
    %9 = vector.broadcast %7 : vector<3x1x1x128xf32> to vector<3x4x1x128xf32>
    %10 = vector.broadcast %8 : vector<1x4x1x128xf32> to vector<3x4x1x128xf32>
    %11 = arith.mulf %9, %10 : vector<3x4x1x128xf32>
    %12 = arith.addf %6, %11 : vector<3x4x1x128xf32>
    %13 = vector.extract_strided_slice %0 {offsets = [0, 2, 0, 0], sizes = [3, 1, 1, 128], strides = [1, 1, 1, 1]} : vector<3x3x1x128xf32> to vector<3x1x1x128xf32>
    %14 = vector.extract_strided_slice %1 {offsets = [2, 0, 0, 0], sizes = [1, 4, 1, 128], strides = [1, 1, 1, 1]} : vector<3x4x1x128xf32> to vector<1x4x1x128xf32>
    %15 = vector.broadcast %13 : vector<3x1x1x128xf32> to vector<3x4x1x128xf32>
    %16 = vector.broadcast %14 : vector<1x4x1x128xf32> to vector<3x4x1x128xf32>
    %17 = arith.mulf %15, %16 : vector<3x4x1x128xf32>
    %18 = arith.addf %12, %17 : vector<3x4x1x128xf32>
    %c0_7 = arith.constant 0 : index
    %c0_8 = arith.constant 0 : index
    %c0_9 = arith.constant 0 : index
    %c0_10 = arith.constant 0 : index
    %19 = vector.load %arg3[%c0_7, %c0_8, %c0_9, %c0_10] : memref<3x4x1x128xf32, #tpu.memory_space<vmem>>, vector<3x4x1x128xf32>
    tpu.vector_store %arg3[%c0_7, %c0_8, %c0_9, %c0_10], %18 {strides = array<i32>} : memref<3x4x1x128xf32, #tpu.memory_space<vmem>>, vector<3x4x1x128xf32>,
    return
  }
  func.func @transform_0(%arg0: i32) -> (i32, i32, i32, i32) {
    %c0_i32 = arith.constant 0 : i32
    %c0_i32_0 = arith.constant 0 : i32
    %c0_i32_1 = arith.constant 0 : i32
    %c0_i32_2 = arith.constant 0 : i32
    return %c0_i32, %c0_i32_0, %arg0, %c0_i32_1 : i32, i32, i32, i32
  }
  func.func @transform_1(%arg0: i32) -> (i32, i32, i32, i32) {
    %c0_i32 = arith.constant 0 : i32
    %c0_i32_0 = arith.constant 0 : i32
    %c0_i32_1 = arith.constant 0 : i32
    %c0_i32_2 = arith.constant 0 : i32
    return %c0_i32, %c0_i32_0, %arg0, %c0_i32_1 : i32, i32, i32, i32
  }
  func.func @transform_2(%arg0: i32) -> (i32, i32, i32, i32) {
    %c0_i32 = arith.constant 0 : i32
    %c0_i32_0 = arith.constant 0 : i32
    %c0_i32_1 = arith.constant 0 : i32
    %c0_i32_2 = arith.constant 0 : i32
    return %c0_i32, %c0_i32_0, %arg0, %c0_i32_1 : i32, i32, i32, i32
  }
}

</mosaic_0001>

<bundles_post_ra>
// kernel: tpu_custom_call.1
= control target key start
LH: loop header
LB: loop body
LE: loop exit
PB: predicated region body
PF: predicated region fallthrough
CT: control target
= control target key end

     0   :  { %7 = vsyncpa [#allocation3], 0  ;;  %s278_s0 = inlined_call_operand.hbm [shape: f32[3,3,1,128], index: 0, kind: input, shape index: {}]   ;;  %s279_s1 = inlined_call_operand.hbm [shape: f32[3,4,1,128], index: 1, kind: input, shape index: {}]   ;;  %s280_s2 = inlined_call_operand.hbm [shape: f32[3,4,1,128], index: 2, kind: output, shape index: {}]  }
   0x1   :  { %8 = vsyncpa [#allocation6], 0 }
   0x2   :  { %9 = vsyncpa [#allocation4], 0  ;;  %s14_s11 = sshll.u32 %s278_s0, 4  ;;  %s240_s12 = smov [#allocation2]   ;;  %s15_s11 = int_to_ptr.hbm [resolvable:$true] %s14_s11 }
   0x3   :  { %s16_s13 = sshll.u32 %s240_s12, 4  ;;  %s27_s16 = sshll.u32 %s279_s1, 4  ;;  %s17_s13 = int_to_ptr.vmem [resolvable:$true] %s16_s13  ;;  %s28_s16 = int_to_ptr.hbm [resolvable:$true] %s27_s16 }
   0x4   :  { %s241_s17 = smov 16   ;;  %s242_s18 = smov 1  }
   0x5   :  { %22 = dma.hbm_to_vmem [thread:$0]  %s15_s11, 144, %s17_s13, [#allocation3], %s241_s17, %s241_s17, %s242_s18  }
   0x6   :  { %s243_s19 = smov [#allocation5]  }
   0x7   :  { %s29_s20 = sshll.u32 %s243_s19, 4  ;;  %s30_s20 = int_to_ptr.vmem [resolvable:$true] %s29_s20 }
   0x8   :  { %35 = dma.hbm_to_vmem [thread:$0]  %s28_s16, 192, %s30_s20, [#allocation6], %s241_s17, %s241_s17, %s242_s18  }
   0x9   :  { %234 = dma.done.wait [#allocation3], 144  }
   0xa   :  { %235 = vsyncadd [#allocation3], 4294967152 }
   0xb   :  { %236 = dma.done.wait [#allocation6], 192  }
   0xc   :  { %237 = vsyncadd [#allocation6], 4294967104  ;;  %v44_v0 = vld [vmem:[#allocation2] sm:$0x1]  ;;  %v45_v1 = vld [vmem:[#allocation2 + $0x1] sm:$0x1] }
   0xd   :  { %v46_v2 = vld [vmem:[#allocation2 + $0x2] sm:$0x1]  ;;  %v53_v3 = vld [vmem:[#allocation5] sm:$0x1]  ;;  %v57_v4 = vld [vmem:[#allocation5 + $0x4] sm:$0x1] }
   0xe   :  { %v61_v5 = vld [vmem:[#allocation5 + $0x8] sm:$0x1]  ;;  %v65_v6 = vmul.f32 %v53_v3, %v44_v0  ;;  %v77_v7 = vmul.f32 %v57_v4, %v45_v1  ;;  %v54_v9 = vld [vmem:[#allocation5 + $0x1] sm:$0x1]  ;;  %v58_v10 = vld [vmem:[#allocation5 + $0x5] sm:$0x1] }
   0xf   :  { %v101_v8 = vmul.f32 %v61_v5, %v46_v2  ;;  %v62_v11 = vld [vmem:[#allocation5 + $0x9] sm:$0x1]  ;;  %v66_v12 = vmul.f32 %v54_v9, %v44_v0  ;;  %v78_v13 = vmul.f32 %v58_v10, %v45_v1  ;;  %v55_v15 = vld [vmem:[#allocation5 + $0x2] sm:$0x1]  ;;  %v59_v16 = vld [vmem:[#allocation5 + $0x6] sm:$0x1] }
  0x10   :  { %v102_v14 = vmul.f32 %v62_v11, %v46_v2  ;;  %v63_v17 = vld [vmem:[#allocation5 + $0xa] sm:$0x1]  ;;  %v89_v18 = vadd.f32 %v77_v7, %v65_v6  ;;  %v67_v19 = vmul.f32 %v55_v15, %v44_v0  ;;  %v79_v20 = vmul.f32 %v59_v16, %v45_v1  ;;  %v56_v22 = vld [vmem:[#allocation5 + $0x3] sm:$0x1]  ;;  %v60_v23 = vld [vmem:[#allocation5 + $0x7] sm:$0x1] }
  0x11   :  { %v103_v21 = vmul.f32 %v63_v17, %v46_v2  ;;  %v64_v24 = vld [vmem:[#allocation5 + $0xb] sm:$0x1]  ;;  %v90_v25 = vadd.f32 %v78_v13, %v66_v12  ;;  %v68_v26 = vmul.f32 %v56_v22, %v44_v0  ;;  %v80_v27 = vmul.f32 %v60_v23, %v45_v1  ;;  %v47_v29 = vld [vmem:[#allocation2 + $0x3] sm:$0x1]  ;;  %v48_v30 = vld [vmem:[#allocation2 + $0x4] sm:$0x1] }
  0x12   :  { %v104_v28 = vmul.f32 %v64_v24, %v46_v2  ;;  %v49_v31 = vld [vmem:[#allocation2 + $0x5] sm:$0x1]  ;;  %v113_v32 = vadd.f32 %v101_v8, %v89_v18  ;;  %v91_v33 = vadd.f32 %v79_v20, %v67_v19  ;;  %v69_v34 = vmul.f32 %v53_v3, %v47_v29  ;;  %v50_v44 = vld [vmem:[#allocation2 + $0x6] sm:$0x1]  ;;  %v51_v45 = vld [vmem:[#allocation2 + $0x7] sm:$0x1] }
  0x13   :  { %v81_v35 = vmul.f32 %v57_v4, %v48_v30  ;;  %v114_v36 = vadd.f32 %v102_v14, %v90_v25  ;;  %v92_v37 = vadd.f32 %v80_v27, %v68_v26  ;;  %v105_v38 = vmul.f32 %v61_v5, %v49_v31  ;;  %v52_v50 = vld [vmem:[#allocation2 + $0x8] sm:$0x1]  ;;  %s244_s0 = smov [#allocation7]   ;;  %s143_s23 = sshll.u32 %s280_s2, 4  ;;  %s144_s23 = int_to_ptr.hbm [resolvable:$true] %s143_s23 }
  0x14   :  { %v70_v39 = vmul.f32 %v54_v9, %v47_v29  ;;  %125 = vst [vmem:[#allocation7] sm:$0x1] %v113_v32  ;;  %v115_v40 = vadd.f32 %v103_v21, %v91_v33  ;;  %v82_v42 = vmul.f32 %v58_v10, %v48_v30  ;;  %v106_v43 = vmul.f32 %v62_v11, %v49_v31  ;;  %s141_s1 = sshll.u32 %s244_s0, 4  ;;  %s142_s1 = int_to_ptr.vmem [resolvable:$true] %s141_s1 }
  0x15   :  { %v93_v41 = vadd.f32 %v81_v35, %v69_v34  ;;  %126 = vst [vmem:[#allocation7 + $0x1] sm:$0x1] %v114_v36  ;;  %v116_v46 = vadd.f32 %v104_v28, %v92_v37  ;;  %v71_v47 = vmul.f32 %v55_v15, %v47_v29  ;;  %v83_v48 = vmul.f32 %v59_v16, %v48_v30 }
  0x16   :  { %v107_v49 = vmul.f32 %v63_v17, %v49_v31  ;;  %127 = vst [vmem:[#allocation7 + $0x2] sm:$0x1] %v115_v40  ;;  %v94_v52 = vadd.f32 %v82_v42, %v70_v39  ;;  %v72_v53 = vmul.f32 %v56_v22, %v47_v29  ;;  %v84_v54 = vmul.f32 %v60_v23, %v48_v30 }
  0x17   :  { %v117_v51 = vadd.f32 %v105_v38, %v93_v41  ;;  %128 = vst [vmem:[#allocation7 + $0x3] sm:$0x1] %v116_v46  ;;  %v95_v55 = vadd.f32 %v83_v48, %v71_v47  ;;  %v108_v56 = vmul.f32 %v64_v24, %v49_v31  ;;  %v73_v57 = vmul.f32 %v53_v3, %v50_v44 }
  0x18   :  { %v85_v58 = vmul.f32 %v57_v4, %v51_v45  ;;  %v118_v59 = vadd.f32 %v106_v43, %v94_v52  ;;  %v96_v60 = vadd.f32 %v84_v54, %v72_v53  ;;  %v109_v61 = vmul.f32 %v61_v5, %v52_v50 }
  0x19   :  { %129 = vst [vmem:[#allocation7 + $0x4] sm:$0x1] %v117_v51  ;;  %v74_v62 = vmul.f32 %v54_v9, %v50_v44  ;;  %v119_v63 = vadd.f32 %v107_v49, %v95_v55  ;;  %v86_v1 = vmul.f32 %v58_v10, %v51_v45  ;;  %v110_v2 = vmul.f32 %v62_v11, %v52_v50 }
  0x1a   :  { %v97_v0 = vadd.f32 %v85_v58, %v73_v57  ;;  %130 = vst [vmem:[#allocation7 + $0x5] sm:$0x1] %v118_v59  ;;  %v120_v6 = vadd.f32 %v108_v56, %v96_v60  ;;  %v75_v7 = vmul.f32 %v55_v15, %v50_v44  ;;  %v87_v8 = vmul.f32 %v59_v16, %v51_v45 }
  0x1b   :  { %v111_v12 = vmul.f32 %v63_v17, %v52_v50  ;;  %131 = vst [vmem:[#allocation7 + $0x6] sm:$0x1] %v119_v63  ;;  %v98_v14 = vadd.f32 %v86_v1, %v74_v62  ;;  %v76_v18 = vmul.f32 %v56_v22, %v50_v44  ;;  %v88_v3 = vmul.f32 %v60_v23, %v51_v45 }
  0x1c   :  { %v121_v13 = vadd.f32 %v109_v61, %v97_v0  ;;  %132 = vst [vmem:[#allocation7 + $0x7] sm:$0x1] %v120_v6  ;;  %v99_v4 = vadd.f32 %v87_v8, %v75_v7  ;;  %v112_v19 = vmul.f32 %v64_v24, %v52_v50 }
  0x1d   :  { %v122_v5 = vadd.f32 %v110_v2, %v98_v14  ;;  %v100_v9 = vadd.f32 %v88_v3, %v76_v18 }
  0x1e   :  { %133 = vst [vmem:[#allocation7 + $0x8] sm:$0x1] %v121_v13  ;;  %v123_v10 = vadd.f32 %v111_v12, %v99_v4 }
  0x1f   :  { %134 = vst [vmem:[#allocation7 + $0x9] sm:$0x1] %v122_v5  ;;  %v124_v11 = vadd.f32 %v112_v19, %v100_v9 }
  0x20   :  { %135 = vst [vmem:[#allocation7 + $0xa] sm:$0x1] %v123_v10 }
  0x21   :  { %136 = vst [vmem:[#allocation7 + $0xb] sm:$0x1] %v124_v11 }
  0x22   :  { %149 = dma.vmem_to_hbm [thread:$0]  %s142_s1, 192, %s144_s23, [#allocation4], %s241_s17, %s241_s17, %s242_s18  }
  0x23   :  { %238 = dma.done.wait [#allocation4], 192  }
  0x24   :  { %239 = vsyncadd [#allocation4], 4294967104 }
  0x25   :  { %154 = vsyncpa [#allocation3], 1 }
  0x26   :  { %155 = vsyncpa [#allocation6], 1 }
  0x27   :  { %156 = vsyncpa [#allocation4], 1 }

</bundles_post_ra>
